<compile_context>
chip_gen: v5e
topology: v5e:2x2
jax: 0.10.0
libtpu: 0.0.40
codegen_flags: <defaults>
</compile_context>

<pallas_src>
import functools

import jax
import jax.numpy as jnp
from jax import lax
from jax.experimental import pallas as pl
from jax.experimental.pallas import tpu as pltpu


_VMEM_LIMIT = 32 * 1024 * 1024


def _round_up(x, m):
    return (x + m - 1) // m * m


def _floor_pow2(x):
    return 1 << (max(int(x), 1).bit_length() - 1)


def _elem_tile(m, row_bytes, budget=6 * 1024 * 1024):
    """Row-tile for elementwise kernels: big, but VMEM-safe on v7x (64MiB)."""
    mp8 = _round_up(m, 8)
    cap = max(8, min(1024, _floor_pow2(budget // max(row_bytes, 1))))
    return min(mp8, cap)


# --------------------------------------------------------------------------
# Pallas kernels
# --------------------------------------------------------------------------

def _mm_kernel(*refs, has_pro, pro_relu, has_epi, epi_relu):
    a_ref, b_ref = refs[0], refs[1]
    idx = 2
    if has_pro:
        ps_ref, pt_ref = refs[idx], refs[idx + 1]
        idx += 2
    if has_epi:
        es_ref, et_ref = refs[idx], refs[idx + 1]
        idx += 2
    o_ref, acc_ref = refs[idx], refs[idx + 1]

    @pl.when(pl.program_id(2) == 0)
    def _():
        acc_ref[...] = jnp.zeros_like(acc_ref)

    a = a_ref[...]
    if has_pro:                      # fused per-input-channel affine (+ReLU)
        a = a * ps_ref[...] + pt_ref[...]
        if pro_relu:
            a = jnp.maximum(a, 0.0)
    acc_ref[...] += jnp.dot(a.astype(jnp.bfloat16), b_ref[...],
                            preferred_element_type=jnp.float32)

    @pl.when(pl.program_id(2) == pl.num_programs(2) - 1)
    def _():
        y = acc_ref[...]
        if has_epi:                  # fused per-output-channel affine (+ReLU)
            y = y * es_ref[...] + et_ref[...]
            if epi_relu:
                y = jnp.maximum(y, 0.0)
        o_ref[...] = y.astype(o_ref.dtype)


def pallas_matmul(a, wdict, *, pro=None, pro_relu=False, epi=None, epi_relu=False):
    """a: (M, K) f32, wdict: {'w': (K, Np) bf16 pre-padded, 'n': N} -> (M, N) f32."""
    w, n_out = wdict['w'], wdict['n']
    M, K = a.shape
    Kw, Np = w.shape
    assert Kw == K, (Kw, K)

    # tile selection: fill the 256-wide MXU, big K chunks, modest M tiles
    tm = min(256, _round_up(M, 8))
    tn = Np
    for cand in (512, 256, 128):
        if Np % cand == 0:
            tn = min(cand, Np)
            break
    if K <= 2048:
        tk = K
    else:
        tk = None
        for cand in (2048, 1024, 512, 256, 128):
            if K % cand == 0:
                tk = cand
                break
        if tk is None:
            tk = 2048
    Kp = _round_up(K, tk)
    Mp = _round_up(M, tm)

    a = a.astype(jnp.float32)
    if (Mp, Kp) != (M, K):
        a = jnp.pad(a, ((0, Mp - M), (0, Kp - K)))
    if Kp != K:
        w = jnp.pad(w, ((0, Kp - K), (0, 0)))

    in_specs = [pl.BlockSpec((tm, tk), lambda i, j, k: (i, k)),
                pl.BlockSpec((tk, tn), lambda i, j, k: (k, j))]
    args = [a, w]
    if pro is not None:
        ps, pt = pro
        ps = jnp.pad(ps.astype(jnp.float32).reshape(1, -1), ((0, 0), (0, Kp - K)))
        pt = jnp.pad(pt.astype(jnp.float32).reshape(1, -1), ((0, 0), (0, Kp - K)))
        in_specs += [pl.BlockSpec((1, tk), lambda i, j, k: (0, k)),
                     pl.BlockSpec((1, tk), lambda i, j, k: (0, k))]
        args += [ps, pt]
    if epi is not None:
        es, et = epi
        es = jnp.pad(es.astype(jnp.float32).reshape(1, -1), ((0, 0), (0, Np - n_out)))
        et = jnp.pad(et.astype(jnp.float32).reshape(1, -1), ((0, 0), (0, Np - n_out)))
        in_specs += [pl.BlockSpec((1, tn), lambda i, j, k: (0, j)),
                     pl.BlockSpec((1, tn), lambda i, j, k: (0, j))]
        args += [es, et]

    kernel = functools.partial(_mm_kernel, has_pro=pro is not None,
                               pro_relu=pro_relu, has_epi=epi is not None,
                               epi_relu=epi_relu)
    out = pl.pallas_call(
        kernel,
        out_shape=jax.ShapeDtypeStruct((Mp, Np), jnp.float32),
        grid_spec=pltpu.PrefetchScalarGridSpec(
            num_scalar_prefetch=0,
            grid=(Mp // tm, Np // tn, Kp // tk),
            in_specs=in_specs,
            out_specs=pl.BlockSpec((tm, tn), lambda i, j, k: (i, j)),
            scratch_shapes=[pltpu.VMEM((tm, tn), jnp.float32)]),
        compiler_params=pltpu.CompilerParams(
            dimension_semantics=("parallel", "parallel", "arbitrary"),
            vmem_limit_bytes=_VMEM_LIMIT),
    )(*args)
    if (Mp, Np) != (M, n_out):
        out = out[:M, :n_out]
    return out


def _affine_kernel(x_ref, s_ref, t_ref, o_ref, *, relu):
    y = x_ref[...] * s_ref[...] + t_ref[...]
    if relu:
        y = jnp.maximum(y, 0.0)
    o_ref[...] = y


def pallas_affine(x, scale, shift, relu):
    """Per-channel scale/shift (+ReLU); x: (M, C) f32."""
    M, C = x.shape
    tm = _elem_tile(M, C * 4 * 2)
    Mp = _round_up(M, tm)
    x = x.astype(jnp.float32)
    if Mp != M:
        x = jnp.pad(x, ((0, Mp - M), (0, 0)))
    out = pl.pallas_call(
        functools.partial(_affine_kernel, relu=relu),
        out_shape=jax.ShapeDtypeStruct((Mp, C), jnp.float32),
        grid_spec=pltpu.PrefetchScalarGridSpec(
            num_scalar_prefetch=0,
            grid=(Mp // tm,),
            in_specs=[pl.BlockSpec((tm, C), lambda i: (i, 0)),
                      pl.BlockSpec((1, C), lambda i: (0, 0)),
                      pl.BlockSpec((1, C), lambda i: (0, 0))],
            out_specs=pl.BlockSpec((tm, C), lambda i: (i, 0))),
        compiler_params=pltpu.CompilerParams(
            dimension_semantics=("parallel",),
            vmem_limit_bytes=_VMEM_LIMIT),
    )(x, scale.reshape(1, C).astype(jnp.float32),
      shift.reshape(1, C).astype(jnp.float32))
    return out[:M] if Mp != M else out


def _residual_kernel(y_ref, r_ref, s3_ref, t3_ref, sr_ref, tr_ref, o_ref):
    out = y_ref[...] * s3_ref[...] + t3_ref[...]                    # bn3
    res = jnp.maximum(r_ref[...] * sr_ref[...] + tr_ref[...], 0.0)  # ds BN + ReLU
    o_ref[...] = jnp.maximum(out + res, 0.0)                        # add + ReLU


def pallas_residual(y, r, s3, t3, sr, tr):
    """Fused bn3(y) + relu(ds_bn(r)) + add + relu; y, r: (M, C)."""
    M, C = y.shape
    tm = _elem_tile(M, C * 4 * 3)
    Mp = _round_up(M, tm)
    y = y.astype(jnp.float32)
    r = r.astype(jnp.float32)
    if Mp != M:
        y = jnp.pad(y, ((0, Mp - M), (0, 0)))
        r = jnp.pad(r, ((0, Mp - M), (0, 0)))
    vecs = [v.reshape(1, C).astype(jnp.float32) for v in (s3, t3, sr, tr)]
    out = pl.pallas_call(
        _residual_kernel,
        out_shape=jax.ShapeDtypeStruct((Mp, C), jnp.float32),
        grid_spec=pltpu.PrefetchScalarGridSpec(
            num_scalar_prefetch=0,
            grid=(Mp // tm,),
            in_specs=[pl.BlockSpec((tm, C), lambda i: (i, 0)),
                      pl.BlockSpec((tm, C), lambda i: (i, 0))] +
                     [pl.BlockSpec((1, C), lambda i: (0, 0))] * 4,
            out_specs=pl.BlockSpec((tm, C), lambda i: (i, 0))),
        compiler_params=pltpu.CompilerParams(
            dimension_semantics=("parallel",),
            vmem_limit_bytes=_VMEM_LIMIT),
    )(y, r, *vecs)
    return out[:M] if Mp != M else out


def _inv_apply_kernel(unf_ref, w_ref, o_ref, *, kk):
    acc = unf_ref[0] * w_ref[:, 0:1]
    for k in range(1, kk):
        acc = acc + unf_ref[k] * w_ref[:, k:k + 1]
    o_ref[...] = acc


def pallas_involution_apply(unf, w):
    """unf: (KK, M, C) k-major patch planes; w: (M, KK) per-pixel kernel -> (M, C)."""
    KK, M, C = unf.shape
    tm = _elem_tile(M, C * 4 * (KK + 1))
    Mp = _round_up(M, tm)
    unf = unf.astype(jnp.float32)
    w = w.astype(jnp.float32)
    if Mp != M:
        unf = jnp.pad(unf, ((0, 0), (0, Mp - M), (0, 0)))
        w = jnp.pad(w, ((0, Mp - M), (0, 0)))
    out = pl.pallas_call(
        functools.partial(_inv_apply_kernel, kk=KK),
        out_shape=jax.ShapeDtypeStruct((Mp, C), jnp.float32),
        grid_spec=pltpu.PrefetchScalarGridSpec(
            num_scalar_prefetch=0,
            grid=(Mp // tm,),
            in_specs=[pl.BlockSpec((KK, tm, C), lambda i: (0, i, 0)),
                      pl.BlockSpec((tm, KK), lambda i: (i, 0))],
            out_specs=pl.BlockSpec((tm, C), lambda i: (i, 0))),
        compiler_params=pltpu.CompilerParams(
            dimension_semantics=("parallel",),
            vmem_limit_bytes=_VMEM_LIMIT),
    )(unf, w)
    return out[:M] if Mp != M else out


# --------------------------------------------------------------------------
# Glue (layout plumbing / pooling / statistics) in plain JAX
# --------------------------------------------------------------------------

def conv1x1(x, wdict, *, stride=1, pro=None, pro_relu=False, epi=None, epi_relu=False):
    if stride > 1:
        x = x[:, ::stride, ::stride, :]
    B, H, W, C = x.shape
    y = pallas_matmul(x.reshape(B * H * W, C), wdict, pro=pro, pro_relu=pro_relu,
                      epi=epi, epi_relu=epi_relu)
    return y.reshape(B, H, W, wdict['n'])


def bn_scale_shift(y, bn, eps=1e-5):
    """Training-mode BatchNorm2d folded into a per-channel (scale, shift)."""
    y2 = y.reshape(-1, y.shape[-1]).astype(jnp.float32)
    mean = jnp.mean(y2, axis=0)
    var = jnp.var(y2, axis=0)                          # biased (PyTorch train mode)
    scale = bn['gamma'] * lax.rsqrt(var + eps)
    return scale, bn['beta'] - mean * scale


def apply_bn(y, bn, relu):
    B, H, W, C = y.shape
    s, t = bn_scale_shift(y, bn)
    out = pallas_affine(y.reshape(-1, C), s, t, relu)
    return out.reshape(B, H, W, C)


def max_pool(x, K, stride, pad):
    return lax.reduce_window(x, jnp.float32(-jnp.inf), lax.max,
                             (1, K, K, 1), (1, stride, stride, 1),
                             ((0, 0), (pad, pad), (pad, pad), (0, 0)))


def avg_pool(x, K, stride, pad):
    s = lax.reduce_window(x, jnp.float32(0.0), lax.add,
                          (1, K, K, 1), (1, stride, stride, 1),
                          ((0, 0), (pad, pad), (pad, pad), (0, 0)))
    return s / float(K * K)     # count_include_pad=True (PyTorch default)


def im2col(x, K, stride, pad):
    """NHWC -> (B*Ho*Wo, K*K*C) for the 7x7 stem conv."""
    B, H, W, C = x.shape
    Ho = (H + 2 * pad - K) // stride + 1
    Wo = (W + 2 * pad - K) // stride + 1
    xp = jnp.pad(x, ((0, 0), (pad, pad), (pad, pad), (0, 0)))
    cols = []
    for kh in range(K):
        for kw in range(K):
            cols.append(xp[:, kh::stride, kw::stride, :][:, :Ho, :Wo, :])
    col = jnp.concatenate(cols, axis=-1)
    return col.reshape(B * Ho * Wo, K * K * C), Ho, Wo


def extract_patches_kmajor(x, K, stride, pad):
    """NHWC -> (K*K, B*Ho*Wo, C) shifted planes (k = kh*K + kw, unfold order)."""
    B, H, W, C = x.shape
    Ho = (H + 2 * pad - K) // stride + 1
    Wo = (W + 2 * pad - K) // stride + 1
    xp = jnp.pad(x, ((0, 0), (pad, pad), (pad, pad), (0, 0)))
    planes = []
    for kh in range(K):
        for kw in range(K):
            sl = xp[:, kh::stride, kw::stride, :][:, :Ho, :Wo, :]
            planes.append(sl.reshape(B * Ho * Wo, C))
    return jnp.stack(planes, axis=0), Ho, Wo


def involution(x, p, stride, K=3, pad=1):
    """RedNet involution, G=1 group: one per-pixel K*K kernel shared by all channels."""
    B, H, W, C = x.shape
    xk = avg_pool(x, stride, stride, 0) if stride > 1 else x
    # kernel generation: reduce 1x1 -> BN+ReLU (fused as span-conv prologue) -> span 1x1 (+bias)
    t_raw = conv1x1(xk, p['inv_reduce'])
    si, ti = bn_scale_shift(t_raw, p['inv_bn'])
    kw = conv1x1(t_raw, p['inv_span'],
                 pro=(si, ti), pro_relu=True,
                 epi=(jnp.ones((K * K,), jnp.float32), p['inv_span_b']))
    Bo, Hk, Wk, KK = kw.shape
    unf, Ho, Wo = extract_patches_kmajor(x, K, stride, pad)
    assert (Hk, Wk) == (Ho, Wo) and KK == K * K
    out = pallas_involution_apply(unf, kw.reshape(B * Ho * Wo, K * K))
    return out.reshape(B, Ho, Wo, C)


def bottleneck(x, p):
    stride = p['stride']
    # conv1 (1x1); its bias is exactly absorbed by the train-mode BN that follows.
    y1 = conv1x1(x, p['conv1'])
    a1 = apply_bn(y1, p['bn1'], relu=True)
    # involution (G=1, K=3, stride, pad=1)
    y2 = involution(a1, p, stride)
    # bn2 + ReLU fused into the conv3 matmul prologue
    s2, t2 = bn_scale_shift(y2, p['bn2'])
    y3 = conv1x1(y2, p['conv3'], pro=(s2, t2), pro_relu=True)
    s3, t3 = bn_scale_shift(y3, p['bn3'])
    # downsample branch is ALWAYS applied (conv1x1(stride) + BN + ReLU), per the module
    yr = conv1x1(x, p['ds'], stride=stride)
    sr, tr = bn_scale_shift(yr, p['ds_bn'])
    B, H, W, C = y3.shape
    out = pallas_residual(y3.reshape(-1, C), yr.reshape(-1, C), s3, t3, sr, tr)
    return out.reshape(B, H, W, C)


def rednet50_forward(x_nchw, params):
    x = jnp.transpose(x_nchw, (0, 2, 3, 1)).astype(jnp.float32)   # NCHW -> NHWC
    B = x.shape[0]
    # stem: 7x7/2 conv (no bias) via im2col + MXU matmul, BN (no ReLU), 3x3/2 max-pool
    col, Ho, Wo = im2col(x, 7, 2, 3)
    y = pallas_matmul(col, params['stem'])
    s0, t0 = bn_scale_shift(y, params['stem_bn'])
    out = pallas_affine(y, s0, t0, relu=False).reshape(B, Ho, Wo, 64)
    out = max_pool(out, 3, 2, 1)
    for layer in ('layer1', 'layer2', 'layer3', 'layer4'):
        for blk in params[layer]:
            out = bottleneck(out, blk)
    out = avg_pool(out, 3, 1, 1)
    # PyTorch's out.view(-1, Hf*Wf*2048) flattens NCHW order
    out_nchw = jnp.transpose(out, (0, 3, 1, 2))
    flat = out_nchw.reshape(out.shape[0], -1)
    logits = pallas_matmul(flat, params['fc'],
                           epi=(jnp.ones((params['fc']['n'],), jnp.float32),
                                params['fc_b']))
    return logits


# --------------------------------------------------------------------------
# Deterministic parameter initialization (weights pre-padded + pre-cast bf16)
# --------------------------------------------------------------------------

class KeyGen:
    def __init__(self, seed):
        self.key = jax.random.PRNGKey(seed)

    def __call__(self):
        self.key, sub = jax.random.split(self.key)
        return sub


def _bn_params(c):
    return {'gamma': jnp.ones((c,), jnp.float32),
            'beta': jnp.zeros((c,), jnp.float32)}


def _make_weight(kg, k, n):
    w = jax.random.normal(kg(), (k, n), jnp.float32) / jnp.sqrt(jnp.float32(k))
    n_pad = _round_up(n, 128)
    if n_pad != n:
        w = jnp.pad(w, ((0, 0), (0, n_pad - n)))
    return {'w': w.astype(jnp.bfloat16), 'n': n}


def init_bottleneck(kg, cin, cout, stride):
    mid = cout // 4
    red = max(mid // 4, 1)
    return {
        'stride': stride,
        'conv1': _make_weight(kg, cin, mid),
        'bn1': _bn_params(mid),
        'inv_reduce': _make_weight(kg, mid, red),
        'inv_bn': _bn_params(red),
        'inv_span': _make_weight(kg, red, 9),
        'inv_span_b': jnp.zeros((9,), jnp.float32),
        'bn2': _bn_params(mid),
        'conv3': _make_weight(kg, mid, cout),
        'bn3': _bn_params(cout),
        'ds': _make_weight(kg, cin, cout),
        'ds_bn': _bn_params(cout),
    }


def init_params(input_hw=64):
    kg = KeyGen(0)
    params = {'stem': _make_weight(kg, 7 * 7 * 3, 64),
              'stem_bn': _bn_params(64)}

    def make_layer(n, cin, cout, stride):
        blocks = [init_bottleneck(kg, cin, cout, stride)]
        for _ in range(n - 1):
            blocks.append(init_bottleneck(kg, cout, cout, 1))
        return blocks

    params['layer1'] = make_layer(3, 64, 256, 1)
    params['layer2'] = make_layer(4, 256, 512, 2)
    params['layer3'] = make_layer(6, 512, 1024, 2)
    params['layer4'] = make_layer(3, 1024, 2048, 2)

    # final spatial after stem(/2), maxpool(/2) and the three stride-2 stages
    s = input_hw
    s = (s + 2 * 3 - 7) // 2 + 1          # stem conv
    s = (s + 2 * 1 - 3) // 2 + 1          # max-pool
    for stride in (1, 2, 2, 2):
        s = (s + 2 * 1 - 3) // stride + 1
    flat = s * s * 2048                   # == 7*7*2048 for the canonical 224x224 input
    params['fc'] = _make_weight(kg, flat, 1000)
    params['fc_b'] = jnp.zeros((1000,), jnp.float32)
    return params


if __name__ == "__main__":
    # NOTE: the canonical RedNet-50 input is (B, 3, 224, 224), which makes the
    # flatten 7*7*2048 = nn.Linear(7*7*2048, 1000).  The smoke test uses a
    # reduced 64x64 input (identical channel/block architecture; fc sized for
    # the resulting 2*2*2048 flatten) so the script also finishes quickly under
    # interpret-mode validation (the previous 224x224/batch-2 run timed out).
    HW = 64
    params = init_params(input_hw=HW)
    x = jax.random.normal(jax.random.PRNGKey(0), (2, 3, HW, HW), jnp.float32)
    out = rednet50_forward(x, params)
    out = jax.block_until_ready(out)
    assert out.shape == (2, 1000)
    assert bool(jnp.all(jnp.isfinite(out)))
    print("KERNEL_OK")
</pallas_src>

<mosaic_0001>
module attributes {stable_mosaic.version = 11 : i64} {
  func.func @_mm_kernel(%arg0: i32, %arg1: i32, %arg2: i32, %arg3: memref<256x147xf32, #tpu.memory_space<vmem>>, %arg4: memref<147x128xbf16, #tpu.memory_space<vmem>>, %arg5: memref<256x128xf32, #tpu.memory_space<vmem>>, %arg6: memref<256x128xf32, #tpu.memory_space<vmem>>) attributes {dimension_semantics = [#tpu.dimension_semantics<parallel>, #tpu.dimension_semantics<parallel>, #tpu.dimension_semantics<arbitrary>], iteration_bounds = array<i64: 8, 1, 1>, scalar_prefetch = 0 : i64, scratch_operands = 1 : i64, tpu.core_type = #tpu.core_type<tc>, window_params = [{transform_indices = @transform_0, window_bounds = array<i64: 256, 147>}, {transform_indices = @transform_1, window_bounds = array<i64: 147, 128>}, {transform_indices = @transform_2, window_bounds = array<i64: 256, 128>}]} {
    %c0_i32 = arith.constant 0 : i32
    %0 = arith.cmpi eq, %arg2, %c0_i32 : i32
    %1 = arith.extui %0 : i1 to i32
    %c0_i32_0 = arith.constant 0 : i32
    %2 = arith.cmpi ne, %1, %c0_i32_0 : i32
    scf.if %2 {
      %cst_10 = arith.constant 0.000000e+00 : f32
      %13 = vector.broadcast %cst_10 : f32 to vector<256x128xf32>
      %c0_11 = arith.constant 0 : index
      %c0_12 = arith.constant 0 : index
      %14 = vector.load %arg6[%c0_11, %c0_12] : memref<256x128xf32, #tpu.memory_space<vmem>>, vector<256x128xf32>
      tpu.vector_store %arg6[%c0_11, %c0_12], %13 {strides = array<i32>} : memref<256x128xf32, #tpu.memory_space<vmem>>, vector<256x128xf32>,
    } else {
    }
    %c0 = arith.constant 0 : index
    %c0_1 = arith.constant 0 : index
    %3 = vector.load %arg3[%c0, %c0_1] : memref<256x147xf32, #tpu.memory_space<vmem>>, vector<256x147xf32>
    %c0_2 = arith.constant 0 : index
    %c0_3 = arith.constant 0 : index
    %4 = vector.load %arg6[%c0_2, %c0_3] : memref<256x128xf32, #tpu.memory_space<vmem>>, vector<256x128xf32>
    %5 = arith.truncf %3 : vector<256x147xf32> to vector<256x147xbf16>
    %c0_4 = arith.constant 0 : index
    %c0_5 = arith.constant 0 : index
    %6 = vector.load %arg4[%c0_4, %c0_5] : memref<147x128xbf16, #tpu.memory_space<vmem>>, vector<147x128xbf16>
    %cst = arith.constant dense<0.000000e+00> : vector<256x128xf32>
    %7 = tpu.matmul %5, %6, %cst {dimension_numbers = #tpu.dot_dimension_numbers<[1], [0], [0], [1], [0, 0, 1, 1], [], []>} : vector<256x147xbf16>, vector<147x128xbf16>, vector<256x128xf32> -> vector<256x128xf32>
    %8 = arith.addf %4, %7 : vector<256x128xf32>
    %c0_6 = arith.constant 0 : index
    %c0_7 = arith.constant 0 : index
    %9 = vector.load %arg6[%c0_6, %c0_7] : memref<256x128xf32, #tpu.memory_space<vmem>>, vector<256x128xf32>
    tpu.vector_store %arg6[%c0_6, %c0_7], %8 {strides = array<i32>} : memref<256x128xf32, #tpu.memory_space<vmem>>, vector<256x128xf32>,
    %c0_i32_8 = arith.constant 0 : i32
    %10 = arith.cmpi eq, %arg2, %c0_i32_8 : i32
    %11 = arith.extui %10 : i1 to i32
    %c0_i32_9 = arith.constant 0 : i32
    %12 = arith.cmpi ne, %11, %c0_i32_9 : i32
    scf.if %12 {
      %c0_10 = arith.constant 0 : index
      %c0_11 = arith.constant 0 : index
      %13 = vector.load %arg6[%c0_10, %c0_11] : memref<256x128xf32, #tpu.memory_space<vmem>>, vector<256x128xf32>
      %c0_12 = arith.constant 0 : index
      %c0_13 = arith.constant 0 : index
      %14 = vector.load %arg5[%c0_12, %c0_13] : memref<256x128xf32, #tpu.memory_space<vmem>>, vector<256x128xf32>
      tpu.vector_store %arg5[%c0_12, %c0_13], %13 {strides = array<i32>} : memref<256x128xf32, #tpu.memory_space<vmem>>, vector<256x128xf32>,
    } else {
    }
    return
  }
  func.func @transform_0(%arg0: i32, %arg1: i32, %arg2: i32) -> (i32, i32) {
    %c0_i32 = arith.constant 0 : i32
    return %arg0, %arg2 : i32, i32
  }
  func.func @transform_1(%arg0: i32, %arg1: i32, %arg2: i32) -> (i32, i32) {
    %c0_i32 = arith.constant 0 : i32
    return %arg2, %arg1 : i32, i32
  }
  func.func @transform_2(%arg0: i32, %arg1: i32, %arg2: i32) -> (i32, i32) {
    %c0_i32 = arith.constant 0 : i32
    return %arg0, %arg1 : i32, i32
  }
}

</mosaic_0001>

<bundles_post_ra>
// kernel: tpu_custom_call.1
= control target key start
LH: loop header
LB: loop body
LE: loop exit
PB: predicated region body
PF: predicated region fallthrough
CT: control target
= control target key end

     0   :  { %7 = vsyncpa [#allocation4], 0  ;;  %s1437_s0 = inlined_call_operand.vmem [shape: f32[2048,147], index: 0, kind: input, shape index: {}]   ;;  %s1438_s1 = inlined_call_operand.vmem [shape: bf16[147,128], index: 1, kind: input, shape index: {}]   ;;  %s1439_s2 = inlined_call_operand.hbm [shape: f32[2048,128], index: 2, kind: output, shape index: {}]  }
   0x1   :  { %9 = vsyncpa [#allocation4 + $0x1], 0  ;;  %s1184_s9 = smov 0   ;;  %s1186_s10 = smov 0  }
   0x2   :  { %s1188_s11 = smov 0   ;;  %s1190_s12 = smov 0  }
   0x3   :  { %s1192_s13 = smov 0   ;;  %s1194_s14 = smov 0  }
   0x4 LB: > { %s940_s15 = sadd.s32 4294967295, %s1164_s14   ;;  %s941_s16 = sadd.s32 4294967294, %s1164_s14   ;;  %s1164_s14 = sphi %s1194_s14, %s15_s14   ;;  %s1160_s13 = sphi %s1192_s13, %s1446_s13   ;;  %s1156_s12 = sphi %s1190_s12, %s1445_s12   ;;  %s1152_s11 = sphi %s1188_s11, %s1444_s11   ;;  %s1148_s10 = sphi %s1186_s10, %s1443_s10   ;;  %s1144_s9 = sphi %s1184_s9, %s1442_s9  }
   0x5   : > { %s34_s17 = sadd.s32 1, %s1160_s13  ;;  %s99_s18 = sadd.s32 1, %s1152_s11 }
   0x6   : > { %p36_p0 = scmp.ge.s32.totalorder %s34_s17, 8  ;;  %p109_p1 = scmp.ne.s32.totalorder %s1152_s11, %s1148_s10 }
   0x7   : > { %p110_p2 = scmp.eq.s32.totalorder %s940_s15, 7  ;;  %p115_p3 = scmp.ne.s32.totalorder %s1148_s10, %s1144_s9 }
   0x8   : > { %s1448_s17 = smov (%p36_p0, %s34_s17), 0  ;;  %p116_p5 = scmp.eq.s32.totalorder %s941_s16, 7 }
   0x9   : > { %p1224_p4 = por %p110_p2, %p109_p1  ;;  %s94_s20 = ssub.s32 %s1160_s13, %s1448_s17 }
   0xa   : > { %p945_p6 = scmp.ge.s32.totalorder %s1164_s14, 1  ;;  %p97_p7 = scmp.eq.s32.totalorder %s94_s20, 0 }
   0xb   : > { %p1231_p8 = por %p116_p5, %p115_p3  ;;  %p161_p9 = scmp.lt.s32.totalorder %s1164_s14, 9 }
   0xc   : > { %s1237_s22 = scalar_select %p97_p7, %s1152_s11, %s99_s18  }
   0xd   : > { %p162_p10 = pnand %p945_p6, %p161_p9 }
   0xe   : > { %s947_s27 = sshll.u32 (!%p162_p10), %s1156_s12, 5  ;;  %s193_s30 = sand.u32 (!%p162_p10), 1, %s1148_s10  }
   0xf   : > { %165 = sbr.rel (%p162_p10) target bundleno = 310 (0x136), region = 28  ;;  %p198_p11 = scmp.lt.s32.totalorder (!%p162_p10), %s947_s27, 255 }
  0x10   : > { %s946_s3 = sshll.u32 (!%p162_p10), %s193_s30, 8  ;;  %s1017_s5 = sshll.u32 (!%p162_p10), %s1156_s12, 8 }
  0x11   : > { %s837_s8 = scalar_lea.hbm (!%p162_p10), %s1439_s2, %s1017_s5  ;;  %s825_s12 = scalar_lea.sflag (!%p162_p10), [#allocation4], %s193_s30 }
  0x12   : > { %s840_s16 = sshll.u32 (!%p162_p10), %s837_s8, 4  ;;  %s1106_s25 = scalar_lea.hbm (!%p162_p10), %s1439_s2, 2048  ;;  %s841_s16 = int_to_ptr.hbm [resolvable:$true] %s840_s16 }
  0x13   : > { %s1100_s18 = sshra.s32 (!%p162_p10), %s841_s16, 4  ;;  %s1101_s18 = int_to_ptr.hbm [resolvable:$true] %s1100_s18 }
  0x14   : > { %v1015_v0 = vld [vmem:[%s1438_s1 + $0x38] sm:$0xff]  ;;  %v401_v1 = vld [vmem:[%s1438_s1 + $0x48] sm:$0x3]  ;;  %vm508_vm0 = vcmask 1040384   ;;  %vm509_vm1 = vcmask 1041408   ;;  %v1014_v3 = vld [vmem:[%s1438_s1 + $0x30] sm:$0xff]  ;;  %p1107_p1 = scmp.lt.s32.totalorder %s1101_s18, %s1439_s2 }
  0x15   : > { %v439_v2 = vunpack.c.l.b16 %v401_v1  ;;  %515 = vmatpush.bf16.msra.mxu0 %v1015_v0  ;;  %1018 = vmatpush.bf16.msra.mxu2 %v1015_v0  ;;  %v1166_v4 = vmov 65535   ;;  %s1450_s27 = smov (!%p198_p11, %s947_s27), 255  ;;  %v1013_v9 = vld [vmem:[%s1438_s1 + $0x28] sm:$0xff]  ;;  %v1016_v10 = vld [vmem:[%s1438_s1 + $0x40] sm:$0xff]  ;;  %vm459_vm2 = vcmask 154624   ;;  %v1011_v18 = vld [vmem:[%s1438_s1 + $0x18] sm:$0xff] }
  0x16   : > { %v510_v5 = vsel %vm508_vm0, 4294967295, %v1166_v4  ;;  %s1007_s4 = sshll.u32 %s1450_s27, 4  ;;  %v1012_v14 = vld [vmem:[%s1438_s1 + $0x20] sm:$0xff]  ;;  %v1010_v19 = vld [vmem:[%s1438_s1 + $0x10] sm:$0xff]  ;;  %v1009_v20 = vld [vmem:[%s1438_s1 + $0x8] sm:$0xff]  ;;  %s1102_s20 = scalar_lea.hbm %s1101_s18, 256 }
  0x17   : > { %v449_v6 = vpack.c.b16 %v439_v2, %v439_v2  ;;  %v511_v7 = vsel %vm509_vm1, %v510_v5, 0  ;;  %s1258_s15 = scalar_lea.vmem %s1437_s0, %s1007_s4  ;;  %v1008_v26 = vld [vmem:[%s1438_s1] sm:$0xff]  ;;  %s1358_s4 = scalar_lea.vmem [#allocation3], %s946_s3 }
  0x18   : > { %v256_v11 = vld [vmem:[%s1258_s15 + $0x8] sm:$0xff]  ;;  %v258_v12 = vld [vmem:[%s1258_s15 + $0x18] sm:$0xff]  ;;  %v255_v27 = vld [vmem:[%s1258_s15] sm:$0xff]  ;;  %p1103_p12 = scmp.ne.s32.totalorder %s1101_s18, %s1102_s20  ;;  %p1108_p2 = scmp.lt.s32.totalorder %s1106_s25, %s1102_s20 }
  0x19   : > { %v513_v8 = vand.u32 %v511_v7, %v449_v6  ;;  %516 = vmatpush.bf16.msra.mxu0 %v1014_v3  ;;  %1019 = vmatpush.bf16.msra.mxu2 %v1014_v3  ;;  %v352_v13 = vpack.c.bf16 %v258_v12, %v256_v11  ;;  %v292_v15 = vld [vmem:[%s1258_s15 + $0x128] sm:$0xff]  ;;  %v294_v16 = vld [vmem:[%s1258_s15 + $0x138] sm:$0xff]  ;;  %v257_v28 = vld [vmem:[%s1258_s15 + $0x10] sm:$0xff] }
  0x1a   : > { %v370_v17 = vpack.c.bf16 %v294_v16, %v292_v15  ;;  %v260_v21 = vld [vmem:[%s1258_s15 + $0x28] sm:$0xff]  ;;  %v262_v22 = vld [vmem:[%s1258_s15 + $0x38] sm:$0xff]  ;;  %v287_v29 = vld [vmem:[%s1258_s15 + $0x100] sm:$0xff]  ;;  %v351_v32 = vpack.c.bf16 %v257_v28, %v255_v27  ;;  %p1104_p13 = pnand %p1103_p12, %p1224_p4  ;;  %p1109_p3 = por %p1108_p2, %p1107_p1 }
  0x1b   : > { %610 = vmatpush.bf16.msra.mxu1 %v513_v8  ;;  %1026 = vmatpush.bf16.msra.mxu3 %v513_v8  ;;  %v296_v23 = vld [vmem:[%s1258_s15 + $0x148] sm:$0xff]  ;;  %v298_v24 = vld [vmem:[%s1258_s15 + $0x158] sm:$0xff]  ;;  %v354_v25 = vpack.c.bf16 %v262_v22, %v260_v21  ;;  %v289_v30 = vld [vmem:[%s1258_s15 + $0x110] sm:$0xff] }
  0x1c   : > { %v372_v31 = vpack.c.bf16 %v298_v24, %v296_v23  ;;  %v367_v33 = vpack.c.bf16 %v289_v30, %v287_v29  ;;  %v264_v34 = vld [vmem:[%s1258_s15 + $0x48] sm:$0xff]  ;;  %v266_v35 = vld [vmem:[%s1258_s15 + $0x58] sm:$0xff]  ;;  %v259_v39 = vld [vmem:[%s1258_s15 + $0x20] sm:$0xff]  ;;  %p1105_p0 = pneg %p1104_p13 }
  0x1d   : > { %517 = vmatpush.bf16.msra.mxu0 %v1013_v9  ;;  %1020 = vmatpush.bf16.msra.mxu2 %v1013_v9  ;;  %v300_v36 = vld [vmem:[%s1258_s15 + $0x168] sm:$0xff]  ;;  %v302_v37 = vld [vmem:[%s1258_s15 + $0x178] sm:$0xff]  ;;  %v356_v38 = vpack.c.bf16 %v266_v35, %v264_v34  ;;  %v261_v40 = vld [vmem:[%s1258_s15 + $0x30] sm:$0xff] }
  0x1e   : > { %v291_v41 = vld [vmem:[%s1258_s15 + $0x120] sm:$0xff]  ;;  %v293_v42 = vld [vmem:[%s1258_s15 + $0x130] sm:$0xff]  ;;  %v374_v43 = vpack.c.bf16 %v302_v37, %v300_v36  ;;  %v353_v44 = vpack.c.bf16 %v261_v40, %v259_v39  ;;  %v268_v46 = vld [vmem:[%s1258_s15 + $0x68] sm:$0xff]  ;;  %p1110_p5 = pnand %p1109_p3, %p1105_p0 }
  0x1f   : > { %611 = vmatpush.bf16.msra.mxu1 %v1016_v10  ;;  %1027 = vmatpush.bf16.msra.mxu3 %v1016_v10  ;;  %v369_v45 = vpack.c.bf16 %v293_v42, %v291_v41  ;;  %v270_v47 = vld [vmem:[%s1258_s15 + $0x78] sm:$0xff]  ;;  %v304_v48 = vld [vmem:[%s1258_s15 + $0x188] sm:$0xff]  ;;  %v263_v51 = vld [vmem:[%s1258_s15 + $0x40] sm:$0xff] }
  0x20   : > { %v306_v49 = vld [vmem:[%s1258_s15 + $0x198] sm:$0xff]  ;;  %v358_v50 = vpack.c.bf16 %v270_v47, %v268_v46  ;;  %v265_v52 = vld [vmem:[%s1258_s15 + $0x50] sm:$0xff]  ;;  %v295_v53 = vld [vmem:[%s1258_s15 + $0x140] sm:$0xff] }
  0x21   : > { %518 = vmatpush.bf16.msra.mxu0 %v1012_v14  ;;  %1021 = vmatpush.bf16.msra.mxu2 %v1012_v14  ;;  %v297_v54 = vld [vmem:[%s1258_s15 + $0x150] sm:$0xff]  ;;  %v376_v55 = vpack.c.bf16 %v306_v49, %v304_v48  ;;  %v355_v56 = vpack.c.bf16 %v265_v52, %v263_v51  ;;  %v272_v58 = vld [vmem:[%s1258_s15 + $0x88] sm:$0xff]  ;;  %v274_v59 = vld [vmem:[%s1258_s15 + $0x98] sm:$0xff] }
  0x22   : > { %986 = vmatmul.msk.bf16.vlgmr.msra.gmra.mxu1 %vm459_vm2, %v352_v13  ;;  %995 = vmatmul.msk.bf16.vlgmr.msra.gmra.mxu3 %vm459_vm2, %v370_v17  ;;  %v371_v57 = vpack.c.bf16 %v297_v54, %v295_v53  ;;  %v308_v60 = vld [vmem:[%s1258_s15 + $0x1a8] sm:$0xff]  ;;  %v310_v61 = vld [vmem:[%s1258_s15 + $0x1b8] sm:$0xff]  ;;  %v360_v62 = vpack.c.bf16 %v274_v59, %v272_v58  ;;  %v267_v63 = vld [vmem:[%s1258_s15 + $0x60] sm:$0xff] }
  0x23   : > { %v269_v0 = vld [vmem:[%s1258_s15 + $0x70] sm:$0xff]  ;;  %v299_v1 = vld [vmem:[%s1258_s15 + $0x160] sm:$0xff]  ;;  %v378_v3 = vpack.c.bf16 %v310_v61, %v308_v60  ;;  %v276_v6 = vld [vmem:[%s1258_s15 + $0xa8] sm:$0xff] }
  0x24   : > { %v301_v2 = vld [vmem:[%s1258_s15 + $0x170] sm:$0xff]  ;;  %v357_v4 = vpack.c.bf16 %v269_v0, %v267_v63  ;;  %v278_v7 = vld [vmem:[%s1258_s15 + $0xb8] sm:$0xff]  ;;  %v312_v8 = vld [vmem:[%s1258_s15 + $0x1c8] sm:$0xff] }
  0x25   : > { %519 = vmatpush.bf16.msra.mxu0 %v1011_v18  ;;  %1022 = vmatpush.bf16.msra.mxu2 %v1011_v18  ;;  %v373_v5 = vpack.c.bf16 %v301_v2, %v299_v1  ;;  %v314_v9 = vld [vmem:[%s1258_s15 + $0x1d8] sm:$0xff]  ;;  %v362_v10 = vpack.c.bf16 %v278_v7, %v276_v6  ;;  %v271_v11 = vld [vmem:[%s1258_s15 + $0x80] sm:$0xff]  ;;  %v273_v12 = vld [vmem:[%s1258_s15 + $0x90] sm:$0xff] }
  0x26   : > { %v303_v13 = vld [vmem:[%s1258_s15 + $0x180] sm:$0xff]  ;;  %v305_v14 = vld [vmem:[%s1258_s15 + $0x190] sm:$0xff]  ;;  %v380_v15 = vpack.c.bf16 %v314_v9, %v312_v8  ;;  %v359_v16 = vpack.c.bf16 %v273_v12, %v271_v11  ;;  %v280_v18 = vld [vmem:[%s1258_s15 + $0xc8] sm:$0xff] }
  0x27   : > { %v375_v17 = vpack.c.bf16 %v305_v14, %v303_v13  ;;  %v318_v21 = vld [vmem:[%s1258_s15 + $0x1f8] sm:$0xff]  ;;  %v275_v23 = vld [vmem:[%s1258_s15 + $0xa0] sm:$0xff]  ;;  %v277_v24 = vld [vmem:[%s1258_s15 + $0xb0] sm:$0xff] }
  0x28   : > { %v361_v28 = vpack.c.bf16 %v277_v24, %v275_v23  ;;  %v284_v30 = vld [vmem:[%s1258_s15 + $0xe8] sm:$0xff]  ;;  %v281_v34 = vld [vmem:[%s1258_s15 + $0xd0] sm:$0xff]  ;;  %v311_v35 = vld [vmem:[%s1258_s15 + $0x1c0] sm:$0xff] }
  0x29   : > { %520 = vmatpush.bf16.msra.mxu0 %v1010_v19  ;;  %1023 = vmatpush.bf16.msra.mxu2 %v1010_v19  ;;  %v282_v19 = vld [vmem:[%s1258_s15 + $0xd8] sm:$0xff]  ;;  %v313_v36 = vld [vmem:[%s1258_s15 + $0x1d0] sm:$0xff]  ;;  %v288_v39 = vld [vmem:[%s1258_s15 + $0x108] sm:$0xff] }
  0x2a   : > { %v364_v22 = vpack.c.bf16 %v282_v19, %v280_v18  ;;  %v290_v40 = vld [vmem:[%s1258_s15 + $0x118] sm:$0xff]  ;;  %v283_v42 = vld [vmem:[%s1258_s15 + $0xe0] sm:$0xff]  ;;  %v317_v46 = vld [vmem:[%s1258_s15 + $0x1f0] sm:$0xff] }
  0x2b   : > { %v368_v41 = vpack.c.bf16 %v290_v40, %v288_v39 }
  0x2d   : > { %521 = vmatpush.bf16.msra.mxu0 %v1009_v20  ;;  %1024 = vmatpush.bf16.msra.mxu2 %v1009_v20  ;;  %v316_v20 = vld [vmem:[%s1258_s15 + $0x1e8] sm:$0xff] }
  0x2e   : > { %v382_v27 = vpack.c.bf16 %v318_v21, %v316_v20 }
  0x31   : > { %522 = vmatpush.bf16.msra.mxu0 %v1008_v26  ;;  %1025 = vmatpush.bf16.msra.mxu2 %v1008_v26  ;;  %v309_v26 = vld [vmem:[%s1258_s15 + $0x1b0] sm:$0xff] }
  0x32   : > { %987 = vmatmul.msk.bf16.gmra.mxu1 %vm459_vm2, %v354_v25  ;;  %996 = vmatmul.msk.bf16.gmra.mxu3 %vm459_vm2, %v372_v31  ;;  %v307_v25 = vld [vmem:[%s1258_s15 + $0x1a0] sm:$0xff]  ;;  %v286_v31 = vld [vmem:[%s1258_s15 + $0xf8] sm:$0xff] }
  0x33   : > { %v377_v29 = vpack.c.bf16 %v309_v26, %v307_v25 }
  0x34   : > { %523 = vmatmul.bf16.vlgmr.msra.gmra.mxu0 %v351_v32  ;;  %563 = vmatmul.bf16.vlgmr.msra.gmra.mxu2 %v367_v33  ;;  %v366_v32 = vpack.c.bf16 %v286_v31, %v284_v30  ;;  %v279_v33 = vld [vmem:[%s1258_s15 + $0xc0] sm:$0xff] }
  0x35   : > { %v363_v37 = vpack.c.bf16 %v281_v34, %v279_v33 }
  0x42   : > { %988 = vmatmul.msk.bf16.gmra.mxu1 %vm459_vm2, %v356_v38  ;;  %997 = vmatmul.msk.bf16.gmra.mxu3 %vm459_vm2, %v374_v43  ;;  %v379_v38 = vpack.c.bf16 %v313_v36, %v311_v35  ;;  %v285_v43 = vld [vmem:[%s1258_s15 + $0xf0] sm:$0xff] }
  0x43   : > { %v365_v47 = vpack.c.bf16 %v285_v43, %v283_v42 }
  0x44   : > { %528 = vmatmul.bf16.gmra.mxu0 %v353_v44  ;;  %568 = vmatmul.bf16.gmra.mxu2 %v369_v45  ;;  %v315_v45 = vld [vmem:[%s1258_s15 + $0x1e0] sm:$0xff]  ;;  %s838_s15 = sshll.u32 %s1358_s4, 4  ;;  %s839_s15 = int_to_ptr.vmem [resolvable:$true] %s838_s15 }
  0x45   : > { %v381_v48 = vpack.c.bf16 %v317_v46, %v315_v45 }
  0x52   : > { %989 = vmatmul.msk.bf16.gmra.mxu1 %vm459_vm2, %v358_v50  ;;  %998 = vmatmul.msk.bf16.gmra.mxu3 %vm459_vm2, %v376_v55 }
  0x54   : > { %533 = vmatmul.bf16.gmra.mxu0 %v355_v56  ;;  %573 = vmatmul.bf16.gmra.mxu2 %v371_v57 }
  0x62   : > { %990 = vmatmul.msk.bf16.gmra.mxu1 %vm459_vm2, %v360_v62  ;;  %999 = vmatmul.msk.bf16.gmra.mxu3 %vm459_vm2, %v378_v3 }
  0x64   : > { %538 = vmatmul.bf16.gmra.mxu0 %v357_v4  ;;  %578 = vmatmul.bf16.gmra.mxu2 %v373_v5 }
  0x72   : > { %991 = vmatmul.msk.bf16.gmra.mxu1 %vm459_vm2, %v362_v10  ;;  %1000 = vmatmul.msk.bf16.gmra.mxu3 %vm459_vm2, %v380_v15 }
  0x74   : > { %543 = vmatmul.bf16.gmra.mxu0 %v359_v16  ;;  %583 = vmatmul.bf16.gmra.mxu2 %v375_v17 }
  0x82   : > { %992 = vmatmul.msk.bf16.gmra.mxu1 %vm459_vm2, %v364_v22  ;;  %1001 = vmatmul.msk.bf16.gmra.mxu3 %vm459_vm2, %v382_v27 }
  0x84   : > { %548 = vmatmul.bf16.gmra.mxu0 %v361_v28  ;;  %588 = vmatmul.bf16.gmra.mxu2 %v377_v29 }
  0x92   : > { %993 = vmatmul.msk.bf16.gmra.mxu1 %vm459_vm2, %v366_v32 }
  0x94   : > { %553 = vmatmul.bf16.gmra.mxu0 %v363_v37  ;;  %593 = vmatmul.bf16.gmra.mxu2 %v379_v38 }
  0x9f   : > { %v613_v44 = vpop.f32.mrf.mxu1 }
  0xa2   : > { %994 = vmatmul.msk.bf16.gmra.mxu1 %vm459_vm2, %v368_v41 }
  0xa4   : > { %558 = vmatmul.bf16.gmra.mxu0 %v365_v47  ;;  %598 = vmatmul.bf16.gmra.mxu2 %v381_v48 }
  0xa5   : > { %v658_v51 = vpop.f32.mrf.mxu3 }
  0xa7   : > { %v615_v49 = vpop.f32.mrf.mxu1 }
  0xad   : > { %v660_v56 = vpop.f32.mrf.mxu3 }
  0xaf   : > { %v618_v50 = vpop.f32.mrf.mxu1 }
  0xb1   : > { %v524_v52 = vpop.f32.mrf.mxu0 }
  0xb2   : > { %v614_v53 = vadd.f32 %v613_v44, %v524_v52 }
  0xb4   : > { %792 = vst [vmem:[%s1358_s4] sm:$0xff] %v614_v53 }
  0xb5   : > { %v663_v63 = vpop.f32.mrf.mxu3 }
  0xb7   : > { %v620_v54 = vpop.f32.mrf.mxu1  ;;  %v1361_v55 = vpop.f32.mrf.mxu2 }
  0xb9   : > { %v526_v57 = vpop.f32.mrf.mxu0 }
  0xba   : > { %v616_v58 = vadd.f32 %v615_v49, %v526_v57 }
  0xbc   : > { %793 = vst [vmem:[%s1358_s4 + $0x8] sm:$0xff] %v616_v58 }
  0xbd   : > { %v665_v5 = vpop.f32.mrf.mxu3 }
  0xbf   : > { %v623_v59 = vpop.f32.mrf.mxu1  ;;  %v1364_v60 = vpop.f32.mrf.mxu2 }
  0xc1   : > { %v529_v61 = vpop.f32.mrf.mxu0 }
  0xc2   : > { %v619_v62 = vadd.f32 %v618_v50, %v529_v61 }
  0xc4   : > { %794 = vst [vmem:[%s1358_s4 + $0x10] sm:$0xff] %v619_v62 }
  0xc5   : > { %v668_v12 = vpop.f32.mrf.mxu3 }
  0xc7   : > { %v625_v0 = vpop.f32.mrf.mxu1  ;;  %v569_v1 = vpop.f32.mrf.mxu2 }
  0xc8   : > { %v659_v2 = vadd.f32 %v658_v51, %v569_v1 }
  0xc9   : > { %v531_v3 = vpop.f32.mrf.mxu0 }
  0xca   : > { %v621_v4 = vadd.f32 %v620_v54, %v531_v3  ;;  %810 = vst [vmem:[%s1358_s4 + $0x90] sm:$0xff] %v659_v2 }
  0xcc   : > { %795 = vst [vmem:[%s1358_s4 + $0x18] sm:$0xff] %v621_v4 }
  0xcd   : > { %v670_v19 = vpop.f32.mrf.mxu3 }
  0xcf   : > { %v628_v6 = vpop.f32.mrf.mxu1  ;;  %v571_v7 = vpop.f32.mrf.mxu2 }
  0xd0   : > { %v661_v8 = vadd.f32 %v660_v56, %v571_v7 }
  0xd1   : > { %v534_v9 = vpop.f32.mrf.mxu0 }
  0xd2   : > { %v624_v10 = vadd.f32 %v623_v59, %v534_v9  ;;  %811 = vst [vmem:[%s1358_s4 + $0x98] sm:$0xff] %v661_v8 }
  0xd4   : > { %796 = vst [vmem:[%s1358_s4 + $0x20] sm:$0xff] %v624_v10 }
  0xd5   : > { %v673_v28 = vpop.f32.mrf.mxu3 }
  0xd7   : > { %v630_v11 = vpop.f32.mrf.mxu1  ;;  %v574_v13 = vpop.f32.mrf.mxu2 }
  0xd8   : > { %v664_v14 = vadd.f32 %v663_v63, %v574_v13 }
  0xd9   : > { %v536_v15 = vpop.f32.mrf.mxu0 }
  0xda   : > { %v626_v16 = vadd.f32 %v625_v0, %v536_v15  ;;  %812 = vst [vmem:[%s1358_s4 + $0xa0] sm:$0xff] %v664_v14 }
  0xdc   : > { %797 = vst [vmem:[%s1358_s4 + $0x28] sm:$0xff] %v626_v16 }
  0xdd   : > { %v675_v34 = vpop.f32.mrf.mxu3 }
  0xdf   : > { %v633_v17 = vpop.f32.mrf.mxu1  ;;  %v576_v18 = vpop.f32.mrf.mxu2 }
  0xe0   : > { %v666_v20 = vadd.f32 %v665_v5, %v576_v18 }
  0xe1   : > { %v539_v21 = vpop.f32.mrf.mxu0 }
  0xe2   : > { %v629_v22 = vadd.f32 %v628_v6, %v539_v21  ;;  %813 = vst [vmem:[%s1358_s4 + $0xa8] sm:$0xff] %v666_v20 }
  0xe4   : > { %798 = vst [vmem:[%s1358_s4 + $0x30] sm:$0xff] %v629_v22 }
  0xe5   : > { %v678_v41 = vpop.f32.mrf.mxu3 }
  0xe7   : > { %v635_v23 = vpop.f32.mrf.mxu1  ;;  %v579_v24 = vpop.f32.mrf.mxu2 }
  0xe8   : > { %v669_v25 = vadd.f32 %v668_v12, %v579_v24 }
  0xe9   : > { %v541_v26 = vpop.f32.mrf.mxu0 }
  0xea   : > { %v631_v27 = vadd.f32 %v630_v11, %v541_v26  ;;  %814 = vst [vmem:[%s1358_s4 + $0xb0] sm:$0xff] %v669_v25 }
  0xec   : > { %799 = vst [vmem:[%s1358_s4 + $0x38] sm:$0xff] %v631_v27 }
  0xed   : > { %v680_v48 = vpop.f32.mrf.mxu3 }
  0xef   : > { %v638_v29 = vpop.f32.mrf.mxu1  ;;  %v581_v30 = vpop.f32.mrf.mxu2 }
  0xf0   : > { %v671_v31 = vadd.f32 %v670_v19, %v581_v30 }
  0xf1   : > { %v544_v32 = vpop.f32.mrf.mxu0 }
  0xf2   : > { %v634_v33 = vadd.f32 %v633_v17, %v544_v32  ;;  %815 = vst [vmem:[%s1358_s4 + $0xb8] sm:$0xff] %v671_v31 }
  0xf4   : > { %800 = vst [vmem:[%s1358_s4 + $0x40] sm:$0xff] %v634_v33 }
  0xf5   : > { %v683_v57 = vpop.f32.mrf.mxu3 }
  0xf7   : > { %v640_v35 = vpop.f32.mrf.mxu1  ;;  %v584_v36 = vpop.f32.mrf.mxu2 }
  0xf8   : > { %v674_v37 = vadd.f32 %v673_v28, %v584_v36 }
  0xf9   : > { %v546_v38 = vpop.f32.mrf.mxu0 }
  0xfa   : > { %v636_v39 = vadd.f32 %v635_v23, %v546_v38  ;;  %816 = vst [vmem:[%s1358_s4 + $0xc0] sm:$0xff] %v674_v37 }
  0xfc   : > { %801 = vst [vmem:[%s1358_s4 + $0x48] sm:$0xff] %v636_v39 }
  0xfd   : > { %v685_v1 = vpop.f32.mrf.mxu3 }
  0xff   : > { %v643_v40 = vpop.f32.mrf.mxu1  ;;  %v586_v42 = vpop.f32.mrf.mxu2 }
 0x100   : > { %v676_v43 = vadd.f32 %v675_v34, %v586_v42 }
 0x101   : > { %v549_v44 = vpop.f32.mrf.mxu0 }
 0x102   : > { %v639_v45 = vadd.f32 %v638_v29, %v549_v44  ;;  %817 = vst [vmem:[%s1358_s4 + $0xc8] sm:$0xff] %v676_v43 }
 0x104   : > { %802 = vst [vmem:[%s1358_s4 + $0x50] sm:$0xff] %v639_v45 }
 0x105   : > { %v688_v8 = vpop.f32.mrf.mxu3 }
 0x107   : > { %v645_v46 = vpop.f32.mrf.mxu1  ;;  %v589_v47 = vpop.f32.mrf.mxu2 }
 0x108   : > { %v679_v49 = vadd.f32 %v678_v41, %v589_v47 }
 0x109   : > { %v551_v50 = vpop.f32.mrf.mxu0 }
 0x10a   : > { %v641_v51 = vadd.f32 %v640_v35, %v551_v50  ;;  %818 = vst [vmem:[%s1358_s4 + $0xd0] sm:$0xff] %v679_v49 }
 0x10c   : > { %803 = vst [vmem:[%s1358_s4 + $0x58] sm:$0xff] %v641_v51 }
 0x10d   : > { %v690_v14 = vpop.f32.mrf.mxu3 }
 0x10f   : > { %v648_v52 = vpop.f32.mrf.mxu1  ;;  %v591_v53 = vpop.f32.mrf.mxu2 }
 0x110   : > { %v681_v54 = vadd.f32 %v680_v48, %v591_v53 }
 0x111   : > { %v554_v56 = vpop.f32.mrf.mxu0 }
 0x112   : > { %v644_v58 = vadd.f32 %v643_v40, %v554_v56  ;;  %819 = vst [vmem:[%s1358_s4 + $0xd8] sm:$0xff] %v681_v54 }
 0x114   : > { %804 = vst [vmem:[%s1358_s4 + $0x60] sm:$0xff] %v644_v58 }
 0x117   : > { %v650_v59 = vpop.f32.mrf.mxu1  ;;  %v594_v61 = vpop.f32.mrf.mxu2 }
 0x118   : > { %v684_v62 = vadd.f32 %v683_v57, %v594_v61 }
 0x119   : > { %v556_v63 = vpop.f32.mrf.mxu0 }
 0x11a   : > { %v646_v0 = vadd.f32 %v645_v46, %v556_v63  ;;  %820 = vst [vmem:[%s1358_s4 + $0xe0] sm:$0xff] %v684_v62 }
 0x11c   : > { %805 = vst [vmem:[%s1358_s4 + $0x68] sm:$0xff] %v646_v0 }
 0x11f   : > { %v653_v2 = vpop.f32.mrf.mxu1  ;;  %v596_v4 = vpop.f32.mrf.mxu2 }
 0x120   : > { %v654_v3 = vadd.f32 %v653_v2, %v1361_v55  ;;  %v686_v5 = vadd.f32 %v685_v1, %v596_v4 }
 0x121   : > { %v559_v6 = vpop.f32.mrf.mxu0 }
 0x122   : > { %808 = vst [vmem:[%s1358_s4 + $0x80] sm:$0xff] %v654_v3  ;;  %v649_v7 = vadd.f32 %v648_v52, %v559_v6 }
 0x123   : > { %821 = vst [vmem:[%s1358_s4 + $0xe8] sm:$0xff] %v686_v5 }
 0x124   : > { %806 = vst [vmem:[%s1358_s4 + $0x70] sm:$0xff] %v649_v7 }
 0x127   : > { %v655_v9 = vpop.f32.mrf.mxu1  ;;  %v599_v11 = vpop.f32.mrf.mxu2 }
 0x128   : > { %v656_v10 = vadd.f32 %v655_v9, %v1364_v60  ;;  %v689_v55 = vadd.f32 %v688_v8, %v599_v11 }
 0x129   : > { %v561_v12 = vpop.f32.mrf.mxu0 }
 0x12a   : > { %809 = vst [vmem:[%s1358_s4 + $0x88] sm:$0xff] %v656_v10  ;;  %v651_v13 = vadd.f32 %v650_v59, %v561_v12 }
 0x12b   : > { %822 = vst [vmem:[%s1358_s4 + $0xf0] sm:$0xff] %v689_v55 }
 0x12c   : > { %807 = vst [vmem:[%s1358_s4 + $0x78] sm:$0xff] %v651_v13 }
 0x12f   : > { %v601_v15 = vpop.f32.mrf.mxu2 }
 0x130   : > { %v691_v60 = vadd.f32 %v690_v14, %v601_v15 }
 0x132   : > { %823 = vst [vmem:[%s1358_s4 + $0xf8] sm:$0xff] %v691_v60 }
 0x133   : > { %1113 = shalt.err (!%p1110_p5)
}
 0x134   : > { %s1167_s28 = smov 128   ;;  %s1168_s29 = smov 8  }
 0x135   : > { %1028 = dma.vmem_to_hbm [thread:$0]  (%p1224_p4), %s839_s15, 4096, %s841_s16, %s825_s12, %s1167_s28, %s1167_s28, %s1168_s29  }
 0x136 PF: > { %p1034_p6 = scmp.ge.s32.totalorder %s1164_s14, 2  ;;  %s855_s30 = sand.u32 1, %s1144_s9  }
 0x137   : > { %s856_s3 = scalar_lea.sflag [#allocation4], %s855_s30 }
 0x138   : > { %p1031_p7 = pnand %p1034_p6, %p1231_p8 }
 0x13a   : > { %p1032_p9 = pneg %p1031_p7 }
 0x13c   : > { %1139 = dma.done.wait (%p1032_p9), %s856_s3, 4096  }
 0x13d   : > { %1141 = vsyncadd (%p1032_p9), %s856_s3, 4294963200  ;;  %s15_s14 = sadd.s32 1, %s1164_s14   ;;  %s1442_s9 = smov %s1148_s10 }
 0x13e   : > { %p12_p10 = scmp.ge.s32.totalorder %s15_s14, 10   ;;  %s1443_s10 = smov %s1152_s11 }
 0x13f   : > { %s1444_s11 = smov %s1237_s22  ;;  %s1445_s12 = smov %s1160_s13 }
 0x140   : > { %s1446_s13 = smov %s1448_s17  ;;  %14 = sbr.rel (!%p12_p10) target bundleno = 4 (0x4), region = 74 }
 0x145   :  { %862 = vsyncpa [#allocation4], 1 }
 0x146   :  { %864 = vsyncpa [#allocation4 + $0x1], 1 }

</bundles_post_ra>
